<compile_context>
chip_gen: v7x
topology: tpu7x:2x2x1
jax: 0.10.0
libtpu: 0.0.40
codegen_flags: <defaults>
</compile_context>

<pallas_src>
import functools

import jax
import jax.numpy as jnp
from jax.experimental import pallas as pl
from jax.experimental.pallas import tpu as pltpu


def _elu(x):
    # ELU(alpha=1): x if x > 0 else exp(x) - 1 (exp argument clamped for safety)
    return jnp.where(x > 0, x, jnp.exp(jnp.minimum(x, 0.0)) - 1.0)


def qmixer_kernel(q_ref, s_ref,
                  w1t_ref, b1t_ref,   # fused first layer, transposed  (2H+2E, D), (2H+2E, 1)
                  w2t_ref, b2t_ref,   # fused block-diag 2nd layer, T  (A*E+E, 2H), (A*E+E, 1)
                  wvb_ref, bvb_ref,   # V-head second layer            (E, 1), (1, 1)
                  out_ref,
                  *, n_agents, embed_dim, hypernet_dim):
    E, H, A = embed_dim, hypernet_dim, n_agents
    AE = A * E

    s = s_ref[...]                          # (D, T) -- already in the MXU dtype
    q = q_ref[...].astype(jnp.float32)      # (A, T)

    # --- fused first layer: rows = [hyper_w_1[0] | hyper_w_final[0] | V[0] | hyper_b_1]
    first = jnp.dot(w1t_ref[...], s, preferred_element_type=jnp.float32) \
        + b1t_ref[...]                                      # (2H+2E, T)
    h12 = jnp.maximum(first[:2 * H, :], 0.0)                # ReLU'd hypernet hiddens (2H, T)
    vh = jnp.maximum(first[2 * H:2 * H + E, :], 0.0)        # V hidden (ReLU)          (E, T)
    b1 = first[2 * H + E:, :]                               # hyper_b_1 (no ReLU)      (E, T)

    # --- fused second layer (block diagonal): rows = [w1 | w_final]
    second = jnp.dot(w2t_ref[...], h12.astype(w2t_ref.dtype),
                     preferred_element_type=jnp.float32) + b2t_ref[...]   # (A*E+E, T)
    w1 = jnp.abs(second[:AE, :])                            # (A*E, T)
    w_final = jnp.abs(second[AE:, :])                       # (E, T)

    # --- hidden = elu(bmm(agent_qs, w1) + b1): per-agent sublane-broadcast MAC.
    mixed = b1
    for a in range(A):                                      # A is small & static
        mixed = mixed + q[a:a + 1, :] * w1[a * E:(a + 1) * E, :]
    hidden = _elu(mixed)                                    # (E, T)

    # --- y = bmm(hidden, w_final) + V(s): one shared sublane reduction.
    y = jnp.sum(hidden * w_final + vh * wvb_ref[...],
                axis=0, keepdims=True) + bvb_ref[...]       # (1, T)
    out_ref[...] = y.astype(out_ref.dtype)                  # lane-dense store


def init_params(key, n_ag, state_dim, embed_dim=32, hypernet_dim=64):
    """Deterministic synthetic params. Layout: W is (in, out), b is (1, out)."""
    def linear(k, fan_in, fan_out):
        kw, kb = jax.random.split(k)
        bound = 1.0 / jnp.sqrt(jnp.float32(fan_in))
        w = jax.random.uniform(kw, (fan_in, fan_out), jnp.float32, -bound, bound)
        b = jax.random.uniform(kb, (1, fan_out), jnp.float32, -bound, bound)
        return w, b

    ks = jax.random.split(key, 7)
    p = {}
    p["w1a"], p["b1a"] = linear(ks[0], state_dim, hypernet_dim)
    p["w1b"], p["b1b"] = linear(ks[1], hypernet_dim, embed_dim * n_ag)
    p["wb1"], p["bb1"] = linear(ks[2], state_dim, embed_dim)
    p["wfa"], p["bfa"] = linear(ks[3], state_dim, hypernet_dim)
    p["wfb"], p["bfb"] = linear(ks[4], hypernet_dim, embed_dim)
    p["wva"], p["bva"] = linear(ks[5], state_dim, embed_dim)
    p["wvb"], p["bvb"] = linear(ks[6], embed_dim, 1)
    return p


def pack_params(params, n_ag, embed_dim, hypernet_dim, mxu_dtype=jnp.bfloat16):
    """Pack the 14 raw (in,out)-layout weights/biases into 6 transposed kernel arrays."""
    E, H, A = embed_dim, hypernet_dim, n_ag
    f32 = jnp.float32
    w_first = jnp.concatenate(
        [params["w1a"], params["wfa"], params["wva"], params["wb1"]], axis=1)   # (D, 2H+2E)
    b_first = jnp.concatenate(
        [params["b1a"], params["bfa"], params["bva"], params["bb1"]], axis=1)   # (1, 2H+2E)
    w_second = jnp.concatenate([
        jnp.concatenate([params["w1b"], jnp.zeros((H, E), f32)], axis=1),
        jnp.concatenate([jnp.zeros((H, A * E), f32), params["wfb"]], axis=1)],
        axis=0)                                                                 # (2H, A*E+E)
    b_second = jnp.concatenate([params["b1b"], params["bfb"]], axis=1)          # (1, A*E+E)
    return {
        "w1t": w_first.T.astype(mxu_dtype),     # (2H+2E, D)   MXU operand
        "b1t": b_first.T.astype(f32),           # (2H+2E, 1)   f32 bias (post-accumulate)
        "w2t": w_second.T.astype(mxu_dtype),    # (A*E+E, 2H)  MXU operand
        "b2t": b_second.T.astype(f32),          # (A*E+E, 1)
        "wvb": params["wvb"].astype(f32),       # (E, 1)
        "bvb": params["bvb"].astype(f32),       # (1, 1)
    }


def _num_tensorcores():
    """Best-effort TensorCore count (v7x has 2/chip, v5e/v6e have 1). Defaults to 1."""
    try:
        info = pltpu.get_tpu_info()
        for name in ("num_cores", "core_count", "num_tensorcores", "tensorcores_per_chip"):
            v = getattr(info, name, None)
            if isinstance(v, int) and 1 <= v <= 8:
                return v
    except Exception:
        pass
    return 1


def _choose_row_tile(n_rows, n_cores):
    # Big tiles amortize the ~0.35us per-grid-step overhead. Only split into
    # multiple (balanced) steps when there are multiple TensorCores to feed.
    # Cap at 2048 so f32 intermediates stay well inside every generation's
    # VMEM budget (v7x: 64 MiB physical, v5e: 16 MiB scoped default raised below).
    target = pl.cdiv(n_rows, max(1, n_cores))
    tile = min(2048, target)
    tile = max(128, ((tile + 127) // 128) * 128)   # lane axis: multiple of 128
    return tile


def qmixer_forward(qs, states, packed, *, n_agents, embed_dim, hypernet_dim,
                   row_tile=None):
    """qs: (B, T, A), states: (B, T, state_dim) -> q_tot: (B, T, 1)"""
    bs = qs.shape[0]
    state_dim = packed["w1t"].shape[1]

    q2 = qs.reshape(-1, n_agents)
    s2 = states.reshape(-1, state_dim)
    n_rows = q2.shape[0]

    if row_tile is None:
        row_tile = _choose_row_tile(n_rows, _num_tensorcores())
    n_padded = pl.cdiv(n_rows, row_tile) * row_tile

    # Rows-on-lanes layout: (A, N) / (D, N), padded along the lane axis.
    # s is cast to the MXU dtype here (bf16 by default -> half the s DMA).
    q2t = q2.T
    s2t = s2.T.astype(packed["w1t"].dtype)
    if n_padded != n_rows:
        q2t = jnp.pad(q2t, ((0, 0), (0, n_padded - n_rows)))
        s2t = jnp.pad(s2t, ((0, 0), (0, n_padded - n_rows)))

    param_order = ["w1t", "b1t", "w2t", "b2t", "wvb", "bvb"]
    param_vals = [packed[k] for k in param_order]
    # The constant (0, 0) index_map below is only valid because every packed
    # param is 2-D (guarded here).
    assert all(p.ndim == 2 for p in param_vals)
    param_specs = [pl.BlockSpec(p.shape, lambda i: (0, 0)) for p in param_vals]

    kernel = functools.partial(qmixer_kernel, n_agents=n_agents,
                               embed_dim=embed_dim, hypernet_dim=hypernet_dim)

    out = pl.pallas_call(
        kernel,
        out_shape=jax.ShapeDtypeStruct((1, n_padded), jnp.float32),
        grid_spec=pltpu.PrefetchScalarGridSpec(
            num_scalar_prefetch=0,
            grid=(n_padded // row_tile,),
            in_specs=[pl.BlockSpec((n_agents, row_tile), lambda i: (0, i)),
                      pl.BlockSpec((state_dim, row_tile), lambda i: (0, i)),
                      *param_specs],
            out_specs=pl.BlockSpec((1, row_tile), lambda i: (0, i)),
        ),
        compiler_params=pltpu.CompilerParams(
            dimension_semantics=("parallel",),
            vmem_limit_bytes=32 * 1024 * 1024),
    )(q2t, s2t, *param_vals)

    return out[0, :n_rows].reshape(bs, -1, 1)


def qmixer_reference(qs, states, params, *, embed_dim=32):
    """Pure-JAX reference mirroring the PyTorch forward (uses raw params)."""
    bs = qs.shape[0]
    n_ag = qs.shape[-1]
    state_dim = params["w1a"].shape[0]
    s = states.reshape(-1, state_dim)
    agent_qs = qs.reshape(-1, 1, n_ag)

    def mlp2(x, wa, ba, wb, bb):
        return jnp.maximum(x @ wa + ba, 0.0) @ wb + bb

    w1 = jnp.abs(mlp2(s, params["w1a"], params["b1a"], params["w1b"], params["b1b"]))
    b1 = s @ params["wb1"] + params["bb1"]
    w1 = w1.reshape(-1, n_ag, embed_dim)
    b1 = b1.reshape(-1, 1, embed_dim)
    hidden = jax.nn.elu(jnp.einsum("bia,bae->bie", agent_qs, w1) + b1)
    w_final = jnp.abs(mlp2(s, params["wfa"], params["bfa"], params["wfb"], params["bfb"]))
    w_final = w_final.reshape(-1, embed_dim, 1)
    v = mlp2(s, params["wva"], params["bva"], params["wvb"], params["bvb"]).reshape(-1, 1, 1)
    y = jnp.einsum("bie,bej->bij", hidden, w_final) + v
    return y.reshape(bs, -1, 1)


if __name__ == "__main__":
    # Small shapes consistent with the module: n_ag=4 agents, state_shape=(16,),
    # embed_dim=32, hypernet_dim=64, batch=2, seq(T)=8 -> N = 16 mixer rows.
    B, T, A, D = 2, 8, 4, 16
    EMBED, HYPER = 32, 64

    key = jax.random.PRNGKey(0)
    k_q, k_s, k_p = jax.random.split(key, 3)
    qs = jax.random.normal(k_q, (B, T, A), jnp.float32)
    states = jax.random.normal(k_s, (B, T, D), jnp.float32)
    params = init_params(k_p, A, D, embed_dim=EMBED, hypernet_dim=HYPER)
    q_ref = qmixer_reference(qs, states, params, embed_dim=EMBED)

    # f32 MXU path: tight check against the pure-JAX reference.
    packed_f32 = pack_params(params, A, EMBED, HYPER, mxu_dtype=jnp.float32)
    q_f32 = jax.block_until_ready(
        qmixer_forward(qs, states, packed_f32,
                       n_agents=A, embed_dim=EMBED, hypernet_dim=HYPER))
    assert q_f32.shape == (B, T, 1), q_f32.shape
    assert jnp.allclose(q_f32, q_ref, atol=1e-4, rtol=1e-4), (
        float(jnp.max(jnp.abs(q_f32 - q_ref))))

    # bf16 MXU path (production default): bf16-in / f32-accumulate tolerance.
    packed_bf16 = pack_params(params, A, EMBED, HYPER, mxu_dtype=jnp.bfloat16)
    q_bf16 = jax.block_until_ready(
        qmixer_forward(qs, states, packed_bf16,
                       n_agents=A, embed_dim=EMBED, hypernet_dim=HYPER))
    assert q_bf16.shape == (B, T, 1), q_bf16.shape
    assert jnp.allclose(q_bf16, q_ref, atol=5e-2, rtol=5e-2), (
        float(jnp.max(jnp.abs(q_bf16 - q_ref))))

    print("KERNEL_OK")
</pallas_src>

<mosaic_0001>
module attributes {stable_mosaic.version = 11 : i64} {
  func.func @qmixer_kernel(%arg0: i32, %arg1: memref<4x128xf32, #tpu.memory_space<vmem>>, %arg2: memref<16x128xf32, #tpu.memory_space<vmem>>, %arg3: memref<192x16xf32, #tpu.memory_space<vmem>>, %arg4: memref<192x1xf32, #tpu.memory_space<vmem>>, %arg5: memref<160x128xf32, #tpu.memory_space<vmem>>, %arg6: memref<160x1xf32, #tpu.memory_space<vmem>>, %arg7: memref<32x1xf32, #tpu.memory_space<vmem>>, %arg8: memref<1x1xf32, #tpu.memory_space<vmem>>, %arg9: memref<1x128xf32, #tpu.memory_space<vmem>>) attributes {dimension_semantics = [#tpu.dimension_semantics<parallel>], iteration_bounds = array<i64: 1>, scalar_prefetch = 0 : i64, scratch_operands = 0 : i64, tpu.core_type = #tpu.core_type<tc>, window_params = [{transform_indices = @transform_0, window_bounds = array<i64: 4, 128>}, {transform_indices = @transform_1, window_bounds = array<i64: 16, 128>}, {pipeline_mode = #tpu.pipeline_mode<synchronous>, transform_indices = @transform_2, window_bounds = array<i64: 192, 16>}, {pipeline_mode = #tpu.pipeline_mode<synchronous>, transform_indices = @transform_3, window_bounds = array<i64: 192, 1>}, {pipeline_mode = #tpu.pipeline_mode<synchronous>, transform_indices = @transform_4, window_bounds = array<i64: 160, 128>}, {pipeline_mode = #tpu.pipeline_mode<synchronous>, transform_indices = @transform_5, window_bounds = array<i64: 160, 1>}, {pipeline_mode = #tpu.pipeline_mode<synchronous>, transform_indices = @transform_6, window_bounds = array<i64: 32, 1>}, {pipeline_mode = #tpu.pipeline_mode<synchronous>, transform_indices = @transform_7, window_bounds = array<i64: 1, 1>}, {transform_indices = @transform_8, window_bounds = array<i64: 1, 128>}]} {
    %c0 = arith.constant 0 : index
    %c0_0 = arith.constant 0 : index
    %0 = vector.load %arg2[%c0, %c0_0] : memref<16x128xf32, #tpu.memory_space<vmem>>, vector<16x128xf32>
    %c0_1 = arith.constant 0 : index
    %c0_2 = arith.constant 0 : index
    %1 = vector.load %arg1[%c0_1, %c0_2] : memref<4x128xf32, #tpu.memory_space<vmem>>, vector<4x128xf32>
    %c0_3 = arith.constant 0 : index
    %c0_4 = arith.constant 0 : index
    %2 = vector.load %arg3[%c0_3, %c0_4] : memref<192x16xf32, #tpu.memory_space<vmem>>, vector<192x16xf32>
    %cst = arith.constant dense<0.000000e+00> : vector<192x128xf32>
    %3 = tpu.matmul %2, %0, %cst {dimension_numbers = #tpu.dot_dimension_numbers<[1], [0], [0], [1], [0, 0, 1, 1], [], []>} : vector<192x16xf32>, vector<16x128xf32>, vector<192x128xf32> -> vector<192x128xf32>
    %c0_5 = arith.constant 0 : index
    %c0_6 = arith.constant 0 : index
    %4 = vector.load %arg4[%c0_5, %c0_6] : memref<192x1xf32, #tpu.memory_space<vmem>>, vector<192x1xf32>
    %5 = vector.broadcast %4 : vector<192x1xf32> to vector<192x128xf32>
    %6 = arith.addf %3, %5 : vector<192x128xf32>
    %7 = vector.extract_strided_slice %6 {offsets = [0, 0], sizes = [128, 128], strides = [1, 1]} : vector<192x128xf32> to vector<128x128xf32>
    %cst_7 = arith.constant 0.000000e+00 : f32
    %8 = vector.broadcast %cst_7 : f32 to vector<128x128xf32>
    %9 = arith.maximumf %7, %8 : vector<128x128xf32>
    %10 = vector.extract_strided_slice %6 {offsets = [128, 0], sizes = [32, 128], strides = [1, 1]} : vector<192x128xf32> to vector<32x128xf32>
    %cst_8 = arith.constant 0.000000e+00 : f32
    %11 = vector.broadcast %cst_8 : f32 to vector<32x128xf32>
    %12 = arith.maximumf %10, %11 : vector<32x128xf32>
    %13 = vector.extract_strided_slice %6 {offsets = [160, 0], sizes = [32, 128], strides = [1, 1]} : vector<192x128xf32> to vector<32x128xf32>
    %c0_9 = arith.constant 0 : index
    %c0_10 = arith.constant 0 : index
    %14 = vector.load %arg5[%c0_9, %c0_10] : memref<160x128xf32, #tpu.memory_space<vmem>>, vector<160x128xf32>
    %cst_11 = arith.constant dense<0.000000e+00> : vector<160x128xf32>
    %15 = tpu.matmul %14, %9, %cst_11 {dimension_numbers = #tpu.dot_dimension_numbers<[1], [0], [0], [1], [0, 0, 1, 1], [], []>} : vector<160x128xf32>, vector<128x128xf32>, vector<160x128xf32> -> vector<160x128xf32>
    %c0_12 = arith.constant 0 : index
    %c0_13 = arith.constant 0 : index
    %16 = vector.load %arg6[%c0_12, %c0_13] : memref<160x1xf32, #tpu.memory_space<vmem>>, vector<160x1xf32>
    %17 = vector.broadcast %16 : vector<160x1xf32> to vector<160x128xf32>
    %18 = arith.addf %15, %17 : vector<160x128xf32>
    %19 = vector.extract_strided_slice %18 {offsets = [0, 0], sizes = [128, 128], strides = [1, 1]} : vector<160x128xf32> to vector<128x128xf32>
    %20 = math.absf %19 : vector<128x128xf32>
    %21 = vector.extract_strided_slice %18 {offsets = [128, 0], sizes = [32, 128], strides = [1, 1]} : vector<160x128xf32> to vector<32x128xf32>
    %22 = math.absf %21 : vector<32x128xf32>
    %23 = vector.extract_strided_slice %1 {offsets = [0, 0], sizes = [1, 128], strides = [1, 1]} : vector<4x128xf32> to vector<1x128xf32>
    %24 = vector.extract_strided_slice %20 {offsets = [0, 0], sizes = [32, 128], strides = [1, 1]} : vector<128x128xf32> to vector<32x128xf32>
    %25 = vector.broadcast %23 : vector<1x128xf32> to vector<32x128xf32>
    %26 = arith.mulf %25, %24 : vector<32x128xf32>
    %27 = arith.addf %13, %26 : vector<32x128xf32>
    %28 = vector.extract_strided_slice %1 {offsets = [1, 0], sizes = [1, 128], strides = [1, 1]} : vector<4x128xf32> to vector<1x128xf32>
    %29 = vector.extract_strided_slice %20 {offsets = [32, 0], sizes = [32, 128], strides = [1, 1]} : vector<128x128xf32> to vector<32x128xf32>
    %30 = vector.broadcast %28 : vector<1x128xf32> to vector<32x128xf32>
    %31 = arith.mulf %30, %29 : vector<32x128xf32>
    %32 = arith.addf %27, %31 : vector<32x128xf32>
    %33 = vector.extract_strided_slice %1 {offsets = [2, 0], sizes = [1, 128], strides = [1, 1]} : vector<4x128xf32> to vector<1x128xf32>
    %34 = vector.extract_strided_slice %20 {offsets = [64, 0], sizes = [32, 128], strides = [1, 1]} : vector<128x128xf32> to vector<32x128xf32>
    %35 = vector.broadcast %33 : vector<1x128xf32> to vector<32x128xf32>
    %36 = arith.mulf %35, %34 : vector<32x128xf32>
    %37 = arith.addf %32, %36 : vector<32x128xf32>
    %38 = vector.extract_strided_slice %1 {offsets = [3, 0], sizes = [1, 128], strides = [1, 1]} : vector<4x128xf32> to vector<1x128xf32>
    %39 = vector.extract_strided_slice %20 {offsets = [96, 0], sizes = [32, 128], strides = [1, 1]} : vector<128x128xf32> to vector<32x128xf32>
    %40 = vector.broadcast %38 : vector<1x128xf32> to vector<32x128xf32>
    %41 = arith.mulf %40, %39 : vector<32x128xf32>
    %42 = arith.addf %37, %41 : vector<32x128xf32>
    %cst_14 = arith.constant 0.000000e+00 : f32
    %43 = vector.broadcast %cst_14 : f32 to vector<32x128xf32>
    %44 = arith.cmpf ogt, %42, %43 : vector<32x128xf32>
    %cst_15 = arith.constant 0.000000e+00 : f32
    %45 = vector.broadcast %cst_15 : f32 to vector<32x128xf32>
    %46 = arith.minimumf %42, %45 : vector<32x128xf32>
    %47 = math.exp %46 : vector<32x128xf32>
    %cst_16 = arith.constant 1.000000e+00 : f32
    %48 = vector.broadcast %cst_16 : f32 to vector<32x128xf32>
    %49 = arith.subf %47, %48 : vector<32x128xf32>
    %50 = arith.select %44, %42, %49 : vector<32x128xi1>, vector<32x128xf32>
    %51 = arith.mulf %50, %22 : vector<32x128xf32>
    %c0_17 = arith.constant 0 : index
    %c0_18 = arith.constant 0 : index
    %52 = vector.load %arg7[%c0_17, %c0_18] : memref<32x1xf32, #tpu.memory_space<vmem>>, vector<32x1xf32>
    %53 = vector.broadcast %52 : vector<32x1xf32> to vector<32x128xf32>
    %54 = arith.mulf %12, %53 : vector<32x128xf32>
    %55 = arith.addf %51, %54 : vector<32x128xf32>
    %cst_19 = arith.constant dense<0.000000e+00> : vector<128xf32>
    %56 = vector.multi_reduction <add>, %55, %cst_19 [0] : vector<32x128xf32> to vector<128xf32>
    %57 = vector.shape_cast %56 : vector<128xf32> to vector<1x128xf32>
    %c0_20 = arith.constant 0 : index
    %c0_21 = arith.constant 0 : index
    %58 = vector.load %arg8[%c0_20, %c0_21] : memref<1x1xf32, #tpu.memory_space<vmem>>, vector<1x1xf32>
    %59 = vector.broadcast %58 : vector<1x1xf32> to vector<1x128xf32>
    %60 = arith.addf %57, %59 : vector<1x128xf32>
    %c0_22 = arith.constant 0 : index
    %c0_23 = arith.constant 0 : index
    %61 = vector.load %arg9[%c0_22, %c0_23] : memref<1x128xf32, #tpu.memory_space<vmem>>, vector<1x128xf32>
    tpu.vector_store %arg9[%c0_22, %c0_23], %60 {strides = array<i32>} : memref<1x128xf32, #tpu.memory_space<vmem>>, vector<1x128xf32>,
    return
  }
  func.func @transform_0(%arg0: i32) -> (i32, i32) {
    %c0_i32 = arith.constant 0 : i32
    %c0_i32_0 = arith.constant 0 : i32
    return %c0_i32, %arg0 : i32, i32
  }
  func.func @transform_1(%arg0: i32) -> (i32, i32) {
    %c0_i32 = arith.constant 0 : i32
    %c0_i32_0 = arith.constant 0 : i32
    return %c0_i32, %arg0 : i32, i32
  }
  func.func @transform_2(%arg0: i32) -> (i32, i32) {
    %c0_i32 = arith.constant 0 : i32
    %c0_i32_0 = arith.constant 0 : i32
    %c0_i32_1 = arith.constant 0 : i32
    return %c0_i32, %c0_i32_0 : i32, i32
  }
  func.func @transform_3(%arg0: i32) -> (i32, i32) {
    %c0_i32 = arith.constant 0 : i32
    %c0_i32_0 = arith.constant 0 : i32
    %c0_i32_1 = arith.constant 0 : i32
    return %c0_i32, %c0_i32_0 : i32, i32
  }
  func.func @transform_4(%arg0: i32) -> (i32, i32) {
    %c0_i32 = arith.constant 0 : i32
    %c0_i32_0 = arith.constant 0 : i32
    %c0_i32_1 = arith.constant 0 : i32
    return %c0_i32, %c0_i32_0 : i32, i32
  }
  func.func @transform_5(%arg0: i32) -> (i32, i32) {
    %c0_i32 = arith.constant 0 : i32
    %c0_i32_0 = arith.constant 0 : i32
    %c0_i32_1 = arith.constant 0 : i32
    return %c0_i32, %c0_i32_0 : i32, i32
  }
  func.func @transform_6(%arg0: i32) -> (i32, i32) {
    %c0_i32 = arith.constant 0 : i32
    %c0_i32_0 = arith.constant 0 : i32
    %c0_i32_1 = arith.constant 0 : i32
    return %c0_i32, %c0_i32_0 : i32, i32
  }
  func.func @transform_7(%arg0: i32) -> (i32, i32) {
    %c0_i32 = arith.constant 0 : i32
    %c0_i32_0 = arith.constant 0 : i32
    %c0_i32_1 = arith.constant 0 : i32
    return %c0_i32, %c0_i32_0 : i32, i32
  }
  func.func @transform_8(%arg0: i32) -> (i32, i32) {
    %c0_i32 = arith.constant 0 : i32
    %c0_i32_0 = arith.constant 0 : i32
    return %c0_i32, %arg0 : i32, i32
  }
}

</mosaic_0001>

<bundles_post_ra>
// kernel: tpu_custom_call.1
= control target key start
LH: loop header
LB: loop body
LE: loop exit
PB: predicated region body
PF: predicated region fallthrough
CT: control target
= control target key end

     0   :  { %s1655_s0 = inlined_call_operand.vmem [shape: f32[4,128], index: 0, kind: input, shape index: {}]   ;;  %s1656_s1 = inlined_call_operand.vmem [shape: f32[16,128], index: 1, kind: input, shape index: {}]   ;;  %s1657_s2 = inlined_call_operand.vmem [shape: f32[192,16], index: 2, kind: input, shape index: {}]   ;;  %s1658_s3 = inlined_call_operand.vmem [shape: f32[192,1], index: 3, kind: input, shape index: {}]   ;;  %s1659_s4 = inlined_call_operand.vmem [shape: f32[160,128], index: 4, kind: input, shape index: {}]   ;;  %s1660_s5 = inlined_call_operand.vmem [shape: f32[160,1], index: 5, kind: input, shape index: {}]   ;;  %s1661_s6 = inlined_call_operand.vmem [shape: f32[32,1], index: 6, kind: input, shape index: {}]   ;;  %s1662_s7 = inlined_call_operand.<no memory space> [shape: f32[1,1], index: 7, kind: input, shape index: {}]   ;;  %s1663_s8 = inlined_call_operand.hbm [shape: f32[1,128], index: 8, kind: output, shape index: {}]  }
   0x1   :  { %v13_v0 = vstv %s1662_s7 }
   0x2   :  { %14 = vst [vmem:[#allocation2] sm:$0x1] %v13_v0 }
   0x3   :  { %v61_v1 = vld [vmem:[%s1658_s3 + $0x10] sm:$0xff]  ;;  %v59_v2 = vld [vmem:[%s1658_s3] sm:$0xff]  ;;  %vm203_vm0 = vcmask 130048   ;;  %v1229_v4 = vmov 0   ;;  %v33_v5 = vld [vmem:[%s1656_s1 + $0x8] sm:$0xff] }
   0x4   :  { %v32_v3 = vld [vmem:[%s1656_s1] sm:$0xff]  ;;  %1196 = vset.pattern.permute.xlu1 %v1229_v4  ;;  %1195 = vset.pattern.permute.xlu0 %v1229_v4  ;;  %v62_v8 = vld [vmem:[%s1658_s3 + $0x18] sm:$0xff]  ;;  %v60_v9 = vld [vmem:[%s1658_s3 + $0x8] sm:$0xff] }
   0x5   :  { %95 = vperm.xlu1 %1196, %v61_v1   ;;  %85 = vperm.xlu0 %1195, %v59_v2   ;;  %v1141_v6 = vpack.c.bf16 %v33_v5, %v32_v3  ;;  %v35_v7 = vld [vmem:[%s1657_s2] sm:$0xff]  ;;  %v36_v10 = vld [vmem:[%s1657_s2 + $0x8] sm:$0xff]  ;;  %v37_v11 = vld [vmem:[%s1657_s2 + $0x10] sm:$0xff] }
   0x6   :  { %1043 = vmatprep.mubr.msk.f32.mxu0 %vm203_vm0, %v35_v7  ;;  %v64_v12 = vld [vmem:[%s1658_s3 + $0x28] sm:$0xff]  ;;  %v63_v13 = vld [vmem:[%s1658_s3 + $0x20] sm:$0xff]  ;;  %v38_v14 = vld [vmem:[%s1657_s2 + $0x18] sm:$0xff] }
   0x7   :  { %1142 = vmatprep.subr.bf16.mxu0 %v1141_v6  ;;  %v39_v15 = vld [vmem:[%s1657_s2 + $0x20] sm:$0xff]  ;;  %v66_v16 = vld [vmem:[%s1658_s3 + $0x38] sm:$0xff]  ;;  %v65_v17 = vld [vmem:[%s1658_s3 + $0x30] sm:$0xff] }
   0x8   :  { %1144 = vmatpush3.bf16.msra.mxu0 %v1141_v6  ;;  %v40_v18 = vld [vmem:[%s1657_s2 + $0x28] sm:$0xff]  ;;  %v41_v19 = vld [vmem:[%s1657_s2 + $0x30] sm:$0xff]  ;;  %v67_v21 = vld [vmem:[%s1658_s3 + $0x40] sm:$0xff] }
   0x9   :  { %100 = vperm.xlu1 %1196, %v62_v8   ;;  %90 = vperm.xlu0 %1195, %v60_v9   ;;  %v68_v20 = vld [vmem:[%s1658_s3 + $0x48] sm:$0xff]  ;;  %v42_v22 = vld [vmem:[%s1657_s2 + $0x38] sm:$0xff]  ;;  %v43_v23 = vld [vmem:[%s1657_s2 + $0x40] sm:$0xff] }
   0xa   :  { %v70_v24 = vld [vmem:[%s1658_s3 + $0x58] sm:$0xff]  ;;  %v69_v25 = vld [vmem:[%s1658_s3 + $0x50] sm:$0xff]  ;;  %v44_v26 = vld [vmem:[%s1657_s2 + $0x48] sm:$0xff] }
   0xb   :  { %1044 = vmatmul.mubr.msk.f32.vlgmr.msra.gmra.mrb[0].mxu0 %vm203_vm0, %v36_v10  ;;  %v45_v27 = vld [vmem:[%s1657_s2 + $0x50] sm:$0xff]  ;;  %v72_v28 = vld [vmem:[%s1658_s3 + $0x68] sm:$0xff]  ;;  %v71_v29 = vld [vmem:[%s1658_s3 + $0x60] sm:$0xff] }
   0xc   :  { %1046 = vmatprep.mubr.msk.f32.mxu0 %vm203_vm0, %v37_v11  ;;  %v46_v30 = vld [vmem:[%s1657_s2 + $0x58] sm:$0xff] }
   0xd   :  { %110 = vperm.xlu1 %1196, %v64_v12   ;;  %105 = vperm.xlu0 %1195, %v63_v13  }
   0xf   :  { %1047 = vmatmul.mubr.msk.f32.gmra.mrb[2].mxu0 %vm203_vm0, %v38_v14 }
  0x10   :  { %1049 = vmatprep.mubr.msk.f32.mxu0 %vm203_vm0, %v39_v15 }
  0x11   :  { %120 = vperm.xlu1 %1196, %v66_v16   ;;  %115 = vperm.xlu0 %1195, %v65_v17  }
  0x13   :  { %1050 = vmatmul.mubr.msk.f32.gmra.mrb[4].mxu0 %vm203_vm0, %v40_v18 }
  0x14   :  { %1052 = vmatprep.mubr.msk.f32.mxu0 %vm203_vm0, %v41_v19 }
  0x15   :  { %130 = vperm.xlu1 %1196, %v68_v20   ;;  %125 = vperm.xlu0 %1195, %v67_v21  }
  0x17   :  { %1053 = vmatmul.mubr.msk.f32.gmra.mrb[6].mxu0 %vm203_vm0, %v42_v22 }
  0x18   :  { %1055 = vmatprep.mubr.msk.f32.mxu0 %vm203_vm0, %v43_v23 }
  0x19   :  { %140 = vperm.xlu1 %1196, %v70_v24   ;;  %135 = vperm.xlu0 %1195, %v69_v25  }
  0x1b   :  { %1056 = vmatmul.mubr.msk.f32.gmra.mrb[8].mxu0 %vm203_vm0, %v44_v26 }
  0x1c   :  { %1058 = vmatprep.mubr.msk.f32.mxu0 %vm203_vm0, %v45_v27 }
  0x1d   :  { %15 = vsyncpa [#allocation4], 0  ;;  %150 = vperm.xlu1 %1196, %v72_v28   ;;  %145 = vperm.xlu0 %1195, %v71_v29   ;;  %v47_v31 = vld [vmem:[%s1657_s2 + $0x60] sm:$0xff]  ;;  %v74_v32 = vld [vmem:[%s1658_s3 + $0x78] sm:$0xff] }
  0x1e   :  { %v73_v33 = vld [vmem:[%s1658_s3 + $0x70] sm:$0xff]  ;;  %v48_v34 = vld [vmem:[%s1657_s2 + $0x68] sm:$0xff]  ;;  %v75_v37 = vld [vmem:[%s1658_s3 + $0x80] sm:$0xff] }
  0x1f   :  { %1059 = vmatmul.mubr.msk.f32.gmra.mrb[10].mxu0 %vm203_vm0, %v46_v30  ;;  %v49_v35 = vld [vmem:[%s1657_s2 + $0x70] sm:$0xff]  ;;  %v76_v36 = vld [vmem:[%s1658_s3 + $0x88] sm:$0xff]  ;;  %v50_v38 = vld [vmem:[%s1657_s2 + $0x78] sm:$0xff] }
  0x20   :  { %1061 = vmatprep.mubr.msk.f32.mxu0 %vm203_vm0, %v47_v31  ;;  %v51_v39 = vld [vmem:[%s1657_s2 + $0x80] sm:$0xff]  ;;  %v77_v41 = vld [vmem:[%s1658_s3 + $0x90] sm:$0xff]  ;;  %v52_v42 = vld [vmem:[%s1657_s2 + $0x88] sm:$0xff] }
  0x21   :  { %160 = vperm.xlu1 %1196, %v74_v32   ;;  %155 = vperm.xlu0 %1195, %v73_v33   ;;  %v501_v40 = vld [vmem:[%s1660_s5] sm:$0xff]  ;;  %v53_v43 = vld [vmem:[%s1657_s2 + $0x90] sm:$0xff]  ;;  %v502_v45 = vld [vmem:[%s1660_s5 + $0x8] sm:$0xff] }
  0x22   :  { %v503_v44 = vld [vmem:[%s1660_s5 + $0x10] sm:$0xff]  ;;  %v54_v46 = vld [vmem:[%s1657_s2 + $0x98] sm:$0xff]  ;;  %v55_v47 = vld [vmem:[%s1657_s2 + $0xa0] sm:$0xff] }
  0x23   :  { %1062 = vmatmul.mubr.msk.f32.gmra.mrb[12].mxu0 %vm203_vm0, %v48_v34  ;;  %v506_v48 = vld [vmem:[%s1660_s5 + $0x28] sm:$0xff]  ;;  %v505_v49 = vld [vmem:[%s1660_s5 + $0x20] sm:$0xff]  ;;  %v57_v51 = vld [vmem:[%s1657_s2 + $0xb0] sm:$0xff] }
  0x24   :  { %1064 = vmatprep.mubr.msk.f32.mxu0 %vm203_vm0, %v49_v35  ;;  %v56_v50 = vld [vmem:[%s1657_s2 + $0xa8] sm:$0xff]  ;;  %v79_v53 = vld [vmem:[%s1658_s3 + $0xa0] sm:$0xff]  ;;  %v58_v54 = vld [vmem:[%s1657_s2 + $0xb8] sm:$0xff] }
  0x25   :  { %170 = vperm.xlu1 %1196, %v76_v36   ;;  %165 = vperm.xlu0 %1195, %v75_v37   ;;  %v80_v52 = vld [vmem:[%s1658_s3 + $0xa8] sm:$0xff]  ;;  %v507_v55 = vld [vmem:[%s1660_s5 + $0x30] sm:$0xff]  ;;  %v504_v56 = vld [vmem:[%s1660_s5 + $0x18] sm:$0xff] }
  0x26   :  { %v510_v57 = vld [vmem:[%s1660_s5 + $0x48] sm:$0xff]  ;;  %v509_v58 = vld [vmem:[%s1660_s5 + $0x40] sm:$0xff]  ;;  %v508_v59 = vld [vmem:[%s1660_s5 + $0x38] sm:$0xff] }
  0x27   :  { %1065 = vmatmul.mubr.msk.f32.gmra.mrb[14].mxu0 %vm203_vm0, %v50_v38  ;;  %v81_v60 = vld [vmem:[%s1658_s3 + $0xb0] sm:$0xff]  ;;  %v513_v61 = vld [vmem:[%s1660_s5 + $0x60] sm:$0xff]  ;;  %v82_v63 = vld [vmem:[%s1658_s3 + $0xb8] sm:$0xff] }
  0x28   :  { %1067 = vmatprep.mubr.msk.f32.mxu0 %vm203_vm0, %v51_v39  ;;  %v511_v62 = vld [vmem:[%s1660_s5 + $0x50] sm:$0xff]  ;;  %v514_v0 = vld [vmem:[%s1660_s5 + $0x68] sm:$0xff]  ;;  %v512_v2 = vld [vmem:[%s1660_s5 + $0x58] sm:$0xff] }
  0x29   :  { %523 = vperm.xlu1 %1196, %v501_v40   ;;  %175 = vperm.xlu0 %1195, %v77_v41   ;;  %v515_v1 = vld [vmem:[%s1660_s5 + $0x70] sm:$0xff]  ;;  %v517_v3 = vld [vmem:[%s1660_s5 + $0x80] sm:$0xff]  ;;  %v516_v4 = vld [vmem:[%s1660_s5 + $0x78] sm:$0xff] }
  0x2a   :  { %v519_v5 = vld [vmem:[%s1660_s5 + $0x90] sm:$0xff]  ;;  %v518_v6 = vld [vmem:[%s1660_s5 + $0x88] sm:$0xff]  ;;  %v520_v7 = vld [vmem:[%s1660_s5 + $0x98] sm:$0xff] }
  0x2b   :  { %1068 = vmatmul.mubr.msk.f32.gmra.mrb[16].mxu0 %vm203_vm0, %v52_v42  ;;  %v78_v8 = vld [vmem:[%s1658_s3 + $0x98] sm:$0xff]  ;;  %v883_v9 = vld [vmem:[%s1661_s6 + $0x8] sm:$0xff]  ;;  %v882_v10 = vld [vmem:[%s1661_s6] sm:$0xff] }
  0x2c   :  { %1070 = vmatprep.mubr.msk.f32.mxu0 %vm203_vm0, %v53_v43  ;;  %v885_v11 = vld [vmem:[%s1661_s6 + $0x18] sm:$0xff]  ;;  %v884_v12 = vld [vmem:[%s1661_s6 + $0x10] sm:$0xff]  ;;  %v923_v13 = vld [vmem:[#allocation2] sm:$0x1] }
  0x2d   :  { %533 = vperm.xlu1 %1196, %v503_v44   ;;  %528 = vperm.xlu0 %1195, %v502_v45   ;;  %v481_v14 = vld [vmem:[%s1659_s4] sm:$0xff] }
  0x2e   :  { %v485_v15 = vld [vmem:[%s1659_s4 + $0x20] sm:$0xff] }
  0x2f   :  { %1071 = vmatmul.mubr.msk.f32.gmra.mrb[18].mxu0 %vm203_vm0, %v54_v46  ;;  %1117 = vmatprep.mubr.f32.mxu1 %v485_v15 }
  0x30   :  { %1073 = vmatprep.mubr.msk.f32.mxu0 %vm203_vm0, %v55_v47 }
  0x31   :  { %548 = vperm.xlu1 %1196, %v506_v48   ;;  %543 = vperm.xlu0 %1195, %v505_v49  }
  0x33   :  { %1074 = vmatmul.mubr.msk.f32.gmra.mrb[20].mxu0 %vm203_vm0, %v56_v50 }
  0x34   :  { %1076 = vmatprep.mubr.msk.f32.mxu0 %vm203_vm0, %v57_v51 }
  0x35   :  { %190 = vperm.xlu1 %1196, %v80_v52   ;;  %185 = vperm.xlu0 %1195, %v79_v53  }
  0x37   :  { %1077 = vmatmul.mubr.msk.f32.gmra.mrb[22].mxu0 %vm203_vm0, %v58_v54 }
  0x38   :  { %1111 = vmatprep.mubr.f32.mxu0 %v481_v14 }
  0x39   :  { %553 = vperm.xlu1 %1196, %v507_v55   ;;  %538 = vperm.xlu0 %1195, %v504_v56  }
  0x3d   :  { %568 = vperm.xlu1 %1196, %v510_v57   ;;  %563 = vperm.xlu0 %1195, %v509_v58  }
  0x41   :  { %558 = vperm.xlu1 %1196, %v508_v59   ;;  %195 = vperm.xlu0 %1195, %v81_v60  }
  0x45   :  { %583 = vperm.xlu1 %1196, %v513_v61   ;;  %573 = vperm.xlu0 %1195, %v511_v62  }
  0x49   :  { %200 = vperm.xlu1 %1196, %v82_v63   ;;  %588 = vperm.xlu0 %1195, %v514_v0  }
  0x4d   :  { %593 = vperm.xlu1 %1196, %v515_v1   ;;  %578 = vperm.xlu0 %1195, %v512_v2  }
  0x51   :  { %603 = vperm.xlu1 %1196, %v517_v3   ;;  %598 = vperm.xlu0 %1195, %v516_v4  }
  0x55   :  { %613 = vperm.xlu1 %1196, %v519_v5   ;;  %608 = vperm.xlu0 %1195, %v518_v6  }
  0x59   :  { %618 = vperm.xlu1 %1196, %v520_v7   ;;  %180 = vperm.xlu0 %1195, %v78_v8  }
  0x5d   :  { %893 = vperm.xlu1 %1196, %v883_v9   ;;  %888 = vperm.xlu0 %1195, %v882_v10  }
  0x61   :  { %903 = vperm.xlu1 %1196, %v885_v11   ;;  %898 = vperm.xlu0 %1195, %v884_v12  }
  0x65   :  { %926 = vperm.xlu0 %1195, %v923_v13  }
  0x84   :  { %v96_v16 = vpop.permute.xlu1 %95  ;;  %v86_v17 = vpop.permute.xlu0 %85 }
  0x88   :  { %v101_v18 = vpop.permute.xlu1 %100  ;;  %v91_v19 = vpop.permute.xlu0 %90 }
  0x8c   :  { %v111_v20 = vpop.permute.xlu1 %110  ;;  %v106_v21 = vpop.permute.xlu0 %105 }
  0x90   :  { %v121_v27 = vpop.permute.xlu1 %120  ;;  %v116_v30 = vpop.permute.xlu0 %115 }
  0x94   :  { %v131_v40 = vpop.permute.xlu1 %130  ;;  %v126_v43 = vpop.permute.xlu0 %125 }
  0x98   :  { %v141_v52 = vpop.permute.xlu1 %140  ;;  %v136_v55 = vpop.permute.xlu0 %135 }
  0x9c   :  { %v151_v1 = vpop.permute.xlu1 %150  ;;  %v146_v4 = vpop.permute.xlu0 %145 }
  0xa0   :  { %v161_v13 = vpop.permute.xlu1 %160 }
  0xde   :  { %v1045_v22 = vpop.f32.mrb[0].mxu0 }
  0xdf   :  { %v348_v23 = vadd.f32 %v1045_v22, %v91_v19  ;;  %v342_v24 = vpop.f32.mrb[1].mxu0 }
  0xe0   :  { %v343_v25 = vadd.f32 %v342_v24, %v86_v17 }
  0xe1   :  { %v462_v26 = vmax.f32 %v348_v23, 0.0 }
  0xe2   :  { %v461_v28 = vmax.f32 %v343_v25, 0.0  ;;  %v1048_v29 = vpop.f32.mrb[2].mxu0 }
  0xe3   :  { %v358_v31 = vadd.f32 %v1048_v29, %v101_v18  ;;  %v352_v32 = vpop.f32.mrb[3].mxu0  ;;  %v486_v29 = vld [vmem:[%s1659_s4 + $0x28] sm:$0xff] }
  0xe4   :  { %v1145_v33 = vpack.c.bf16 %v462_v26, %v461_v28  ;;  %v353_v34 = vadd.f32 %v352_v32, %v96_v16  ;;  %v156_v16 = vpop.permute.xlu0 %155  ;;  %v482_v28 = vld [vmem:[%s1659_s4 + $0x8] sm:$0xff] }
  0xe5   :  { %v464_v35 = vmax.f32 %v358_v31, 0.0  ;;  %v487_v31 = vld [vmem:[%s1659_s4 + $0x30] sm:$0xff] }
  0xe6   :  { %v463_v36 = vmax.f32 %v353_v34, 0.0  ;;  %v1051_v37 = vpop.f32.mrb[4].mxu0  ;;  %1146 = vmatprep.subr.bf16.mxu0 %v1145_v33  ;;  %1177 = vmatprep.subr.bf16.mxu1 %v1145_v33  ;;  %v484_v34 = vld [vmem:[%s1659_s4 + $0x18] sm:$0xff] }
  0xe7   :  { %v368_v38 = vadd.f32 %v1051_v37, %v111_v20  ;;  %v362_v39 = vpop.f32.mrb[5].mxu0  ;;  %1148 = vmatpush3.bf16.msra.mxu0 %v1145_v33  ;;  %1185 = vmatpush3.bf16.msra.mxu1 %v1145_v33 }
  0xe8   :  { %v1149_v41 = vpack.c.bf16 %v464_v35, %v463_v36  ;;  %v363_v42 = vadd.f32 %v362_v39, %v106_v21  ;;  %v488_v35 = vld [vmem:[%s1659_s4 + $0x38] sm:$0xff]  ;;  %v489_v36 = vld [vmem:[%s1659_s4 + $0x40] sm:$0xff]  ;;  %v490_v39 = vld [vmem:[%s1659_s4 + $0x48] sm:$0xff] }
  0xe9   :  { %v466_v44 = vmax.f32 %v368_v38, 0.0 }
  0xea   :  { %v465_v45 = vmax.f32 %v363_v42, 0.0  ;;  %v1054_v46 = vpop.f32.mrb[6].mxu0  ;;  %1150 = vmatprep.subr.bf16.mxu0 %v1149_v41  ;;  %1178 = vmatprep.subr.bf16.mxu1 %v1149_v41  ;;  %v493_v42 = vld [vmem:[%s1659_s4 + $0x60] sm:$0xff] }
  0xeb   :  { %v378_v47 = vadd.f32 %v1054_v46, %v121_v27  ;;  %v372_v48 = vpop.f32.mrb[7].mxu0  ;;  %1152 = vmatpush3.bf16.msra.mxu0 %v1149_v41  ;;  %1186 = vmatpush3.bf16.msra.mxu1 %v1149_v41  ;;  %v492_v41 = vld [vmem:[%s1659_s4 + $0x58] sm:$0xff]  ;;  %v497_v46 = vld [vmem:[%s1659_s4 + $0x80] sm:$0xff] }
  0xec   :  { %v1153_v49 = vpack.c.bf16 %v466_v44, %v465_v45  ;;  %v373_v50 = vadd.f32 %v372_v48, %v116_v30  ;;  %v483_v30 = vld [vmem:[%s1659_s4 + $0x10] sm:$0xff]  ;;  %v496_v45 = vld [vmem:[%s1659_s4 + $0x78] sm:$0xff] }
  0xed   :  { %v468_v51 = vmax.f32 %v378_v47, 0.0  ;;  %v495_v44 = vld [vmem:[%s1659_s4 + $0x70] sm:$0xff]  ;;  %v498_v47 = vld [vmem:[%s1659_s4 + $0x88] sm:$0xff] }
  0xee   :  { %v467_v53 = vmax.f32 %v373_v50, 0.0  ;;  %v1057_v54 = vpop.f32.mrb[8].mxu0  ;;  %1154 = vmatprep.subr.bf16.mxu0 %v1153_v49  ;;  %1179 = vmatprep.subr.bf16.mxu1 %v1153_v49  ;;  %v499_v48 = vld [vmem:[%s1659_s4 + $0x90] sm:$0xff]  ;;  %v1601_v50 = vpop.permute.xlu1 %170 }
  0xef   :  { %v388_v56 = vadd.f32 %v1057_v54, %v131_v40  ;;  %v382_v57 = vpop.f32.mrb[9].mxu0  ;;  %1156 = vmatpush3.bf16.msra.mxu0 %v1153_v49  ;;  %1187 = vmatpush3.bf16.msra.mxu1 %v1153_v49  ;;  %v491_v40 = vld [vmem:[%s1659_s4 + $0x50] sm:$0xff]  ;;  %v500_v49 = vld [vmem:[%s1659_s4 + $0x98] sm:$0xff] }
  0xf0   :  { %v1157_v58 = vpack.c.bf16 %v468_v51, %v467_v53  ;;  %v383_v59 = vadd.f32 %v382_v57, %v126_v43  ;;  %v494_v43 = vld [vmem:[%s1659_s4 + $0x68] sm:$0xff]  ;;  %v1603_v51 = vpop.permute.xlu0 %165 }
  0xf1   :  { %v470_v60 = vmax.f32 %v388_v56, 0.0 }
  0xf2   :  { %v469_v61 = vmax.f32 %v383_v59, 0.0  ;;  %v1060_v62 = vpop.f32.mrb[10].mxu0  ;;  %1158 = vmatprep.subr.bf16.mxu0 %v1157_v58  ;;  %1180 = vmatprep.subr.bf16.mxu1 %v1157_v58 }
  0xf3   :  { %v398_v63 = vadd.f32 %v1060_v62, %v141_v52  ;;  %v392_v0 = vpop.f32.mrb[11].mxu0  ;;  %1160 = vmatpush3.bf16.msra.mxu0 %v1157_v58  ;;  %1188 = vmatpush3.bf16.msra.mxu1 %v1157_v58  ;;  %v524_v52 = vpop.permute.xlu1 %523 }
  0xf4   :  { %v1161_v2 = vpack.c.bf16 %v470_v60, %v469_v61  ;;  %v393_v3 = vadd.f32 %v392_v0, %v136_v55  ;;  %v1605_v53 = vpop.permute.xlu0 %175 }
  0xf5   :  { %v472_v5 = vmax.f32 %v398_v63, 0.0 }
  0xf6   :  { %v471_v6 = vmax.f32 %v393_v3, 0.0  ;;  %v1063_v7 = vpop.f32.mrb[12].mxu0  ;;  %1162 = vmatprep.subr.bf16.mxu0 %v1161_v2  ;;  %1181 = vmatprep.subr.bf16.mxu1 %v1161_v2 }
  0xf7   :  { %v408_v8 = vadd.f32 %v1063_v7, %v151_v1  ;;  %v402_v9 = vpop.f32.mrb[13].mxu0  ;;  %1164 = vmatpush3.bf16.msra.mxu0 %v1161_v2  ;;  %1189 = vmatpush3.bf16.msra.mxu1 %v1161_v2  ;;  %v534_v54 = vpop.permute.xlu1 %533  ;;  %v806_v1 = vlaneseq }
  0xf8   :  { %v1165_v10 = vpack.c.bf16 %v472_v5, %v471_v6  ;;  %v403_v11 = vadd.f32 %v402_v9, %v146_v4  ;;  %v529_v55 = vpop.permute.xlu0 %528  ;;  %v1614_v5 = vld [vmem:[%s1655_s0] sm:$0xf]  ;;  %s1230_s0 = smov [#allocation3]  }
  0xf9   :  { %v474_v12 = vmax.f32 %v408_v8, 0.0  ;;  %v1607_v3 = vshrl.u32 %v806_v1, 7  ;;  %s941_s18 = sshll.u32 %s1230_s0, 4  ;;  %s942_s18 = int_to_ptr.vmem [resolvable:$true] %s941_s18 }
  0xfa   :  { %v473_v14 = vmax.f32 %v403_v11, 0.0  ;;  %v1066_v15 = vpop.f32.mrb[14].mxu0  ;;  %1166 = vmatprep.subr.bf16.mxu0 %v1165_v10  ;;  %1182 = vmatprep.subr.bf16.mxu1 %v1165_v10  ;;  %s1205_s19 = scalar_lea.vmem %s942_s18, 16  ;;  %s1209_s1 = scalar_lea.vmem %s942_s18, 32 }
  0xfb   :  { %v418_v17 = vadd.f32 %v1066_v15, %v161_v13  ;;  %v412_v18 = vpop.f32.mrb[15].mxu0  ;;  %1168 = vmatpush3.bf16.msra.mxu0 %v1165_v10  ;;  %1190 = vmatpush3.bf16.msra.mxu1 %v1165_v10  ;;  %v549_v56 = vpop.permute.xlu1 %548  ;;  %v808_v7 = vsub.s32 0, %v1607_v3  ;;  %v820_v8 = vsub.s32 1, %v1607_v3  ;;  %p1206_p0 = scmp.ne.s32.totalorder %s942_s18, %s1205_s19  ;;  %p1210_p1 = scmp.lt.s32.totalorder %s942_s18, %s942_s18 }
  0xfc   :  { %v1169_v19 = vpack.c.bf16 %v474_v12, %v473_v14  ;;  %v413_v20 = vadd.f32 %v412_v18, %v156_v16  ;;  %v544_v57 = vpop.permute.xlu0 %543  ;;  %p1211_p2 = scmp.lt.s32.totalorder %s1209_s1, %s1205_s19 }
  0xfd   :  { %v476_v21 = vmax.f32 %v418_v17, 0.0  ;;  %v809_v11 = vrot.slane %v1614_v5, %v808_v7 }
  0xfe   :  { %v475_v22 = vmax.f32 %v413_v20, 0.0  ;;  %v1531_v23 = vpop.f32.mrb[16].mxu0  ;;  %1170 = vmatprep.subr.bf16.mxu0 %v1169_v19  ;;  %1183 = vmatprep.subr.bf16.mxu1 %v1169_v19  ;;  %p1212_p3 = por %p1211_p2, %p1210_p1 }
  0xff   :  { %v1533_v24 = vpop.f32.mrb[17].mxu0  ;;  %1172 = vmatpush3.bf16.msra.mxu0 %v1169_v19  ;;  %1191 = vmatpush3.bf16.msra.mxu1 %v1169_v19  ;;  %v191_v58 = vpop.permute.xlu1 %190 }
 0x100   :  { %v1173_v25 = vpack.c.bf16 %v476_v21, %v475_v22  ;;  %v186_v59 = vpop.permute.xlu0 %185  ;;  %v821_v21 = vrot.slane %v1614_v5, %v820_v8  ;;  %p1213_p4 = pnand %p1212_p3, %p1206_p0 }
 0x102   :  { %v1535_v26 = vpop.f32.mrb[18].mxu0  ;;  %1174 = vmatprep.subr.bf16.mxu0 %v1173_v25  ;;  %1184 = vmatprep.subr.bf16.mxu1 %v1173_v25 }
 0x103   :  { %v1537_v27 = vpop.f32.mrb[19].mxu0  ;;  %1176 = vmatpush3.bf16.msra.mxu0 %v1173_v25  ;;  %1192 = vmatpush3.bf16.msra.mxu1 %v1173_v25  ;;  %v554_v60 = vpop.permute.xlu1 %553 }
 0x104   :  { %v539_v61 = vpop.permute.xlu0 %538 }
 0x106   :  { %v1551_v32 = vpop.f32.mrb[20].mxu0  ;;  %1112 = vmatmul.mubr.f32.vlgmr.msra.gmra.mrb[24].mxu0 %v482_v28  ;;  %1118 = vmatmul.mubr.f32.vlgmr.msra.gmra.mrb[0].mxu1 %v486_v29 }
 0x107   :  { %v1553_v33 = vpop.f32.mrb[21].mxu0  ;;  %1114 = vmatprep.mubr.f32.mxu0 %v483_v30  ;;  %1120 = vmatprep.mubr.f32.mxu1 %v487_v31  ;;  %v569_v62 = vpop.permute.xlu1 %568  ;;  %v448_v22 = vadd.f32 %v1551_v32, %v191_v58 }
 0x108   :  { %v564_v63 = vpop.permute.xlu0 %563  ;;  %v443_v25 = vadd.f32 %v1553_v33, %v186_v59 }
 0x10a   :  { %v1564_v37 = vpop.f32.mrb[22].mxu0  ;;  %1115 = vmatmul.mubr.f32.gmra.mrb[26].mxu0 %v484_v34  ;;  %1121 = vmatmul.mubr.f32.gmra.mrb[2].mxu1 %v488_v35 }
 0x10b   :  { %v1566_v38 = vpop.f32.mrb[23].mxu0  ;;  %1123 = vmatprep.mubr.f32.mxu1 %v489_v36  ;;  %v559_v0 = vpop.permute.xlu1 %558 }
 0x10c   :  { %v196_v2 = vpop.permute.xlu0 %195 }
 0x10e   :  { %1124 = vmatmul.mubr.f32.gmra.mrb[4].mxu1 %v490_v39 }
 0x10f   :  { %1126 = vmatprep.mubr.f32.mxu1 %v491_v40  ;;  %v1609_v4 = vpop.permute.xlu1 %583 }
 0x110   :  { %v1616_v6 = vpop.permute.xlu0 %573 }
 0x112   :  { %1127 = vmatmul.mubr.f32.gmra.mrb[6].mxu1 %v492_v41  ;;  %v832_v41 = vsub.s32 2, %v1607_v3 }
 0x113   :  { %1129 = vmatprep.mubr.f32.mxu1 %v493_v42  ;;  %v201_v18 = vpop.permute.xlu1 %200 }
 0x114   :  { %v589_v42 = vpop.permute.xlu0 %588 }
 0x116   :  { %1130 = vmatmul.mubr.f32.gmra.mrb[8].mxu1 %v494_v43  ;;  %v458_v43 = vadd.f32 %v1564_v37, %v201_v18  ;;  %v453_v37 = vadd.f32 %v1566_v38, %v196_v2 }
 0x117   :  { %1132 = vmatprep.mubr.f32.mxu1 %v495_v44 }
 0x11a   :  { %1133 = vmatmul.mubr.f32.gmra.mrb[10].mxu1 %v496_v45 }
 0x11b   :  { %1135 = vmatprep.mubr.f32.mxu1 %v497_v46 }
 0x11e   :  { %1136 = vmatmul.mubr.f32.gmra.mrb[12].mxu1 %v498_v47 }
 0x11f   :  { %1138 = vmatprep.mubr.f32.mxu1 %v499_v48 }
 0x122   :  { %1139 = vmatmul.mubr.f32.gmra.mrb[14].mxu1 %v500_v49 }
 0x1d9   :  { %v1113_v9 = vpop.f32.mrb[24].mxu0  ;;  %v1119_v10 = vpop.f32.mrb[0].mxu1 }
 0x1da   :  { %v693_v12 = vadd.f32 %v1113_v9, %v529_v55  ;;  %v713_v13 = vadd.f32 %v1119_v10, %v549_v56  ;;  %v687_v14 = vpop.f32.mrb[25].mxu0  ;;  %v707_v15 = vpop.f32.mrb[1].mxu1 }
 0x1db   :  { %v688_v16 = vadd.f32 %v687_v14, %v524_v52  ;;  %v708_v17 = vadd.f32 %v707_v15, %v544_v57 }
 0x1dc   :  { %v787_v19 = vand.u32 2147483647, %v693_v12  ;;  %v791_v20 = vand.u32 2147483647, %v713_v13  ;;  %v579_v13 = vpop.permute.xlu0 %578 }
 0x1dd   :  { %v786_v28 = vand.u32 2147483647, %v688_v16  ;;  %v790_v29 = vand.u32 2147483647, %v708_v17  ;;  %v1116_v30 = vpop.f32.mrb[26].mxu0  ;;  %v1122_v31 = vpop.f32.mrb[2].mxu1 }
 0x1de   :  { %v811_v34 = vmul.f32 %v809_v11, %v787_v19  ;;  %v703_v35 = vadd.f32 %v1116_v30, %v539_v61  ;;  %v723_v36 = vadd.f32 %v1122_v31, %v559_v0  ;;  %v697_v39 = vpop.f32.mrb[27].mxu0  ;;  %v717_v40 = vpop.f32.mrb[3].mxu1  ;;  %v823_v47 = vmul.f32 %v821_v21, %v791_v20 }
 0x1df   :  { %v810_v44 = vmul.f32 %v809_v11, %v786_v28  ;;  %v698_v45 = vadd.f32 %v697_v39, %v534_v54  ;;  %v718_v46 = vadd.f32 %v717_v40, %v554_v60  ;;  %v822_v52 = vmul.f32 %v821_v21, %v790_v29 }
 0x1e0   :  { %v815_v32 = vadd.f32 %v811_v34, %v448_v22  ;;  %v789_v33 = vand.u32 2147483647, %v703_v35  ;;  %v793_v48 = vand.u32 2147483647, %v723_v36  ;;  %v833_v0 = vrot.slane %v1614_v5, %v832_v41 }
 0x1e1   :  { %v814_v49 = vadd.f32 %v810_v44, %v443_v25  ;;  %v788_v55 = vand.u32 2147483647, %v698_v45  ;;  %v792_v56 = vand.u32 2147483647, %v718_v46  ;;  %v1125_v57 = vpop.f32.mrb[4].mxu1  ;;  %v844_v22 = vsub.s32 3, %v1607_v3  ;;  %v599_v44 = vpop.permute.xlu0 %598 }
 0x1e2   :  { %v827_v58 = vadd.f32 %v823_v47, %v815_v32  ;;  %v813_v59 = vmul.f32 %v809_v11, %v789_v33  ;;  %v733_v61 = vadd.f32 %v1125_v57, %v569_v62  ;;  %v727_v1 = vpop.f32.mrb[5].mxu1  ;;  %v825_v10 = vmul.f32 %v821_v21, %v793_v48 }
 0x1e3   :  { %v826_v8 = vadd.f32 %v822_v52, %v814_v49  ;;  %v812_v54 = vmul.f32 %v809_v11, %v788_v55  ;;  %v728_v60 = vadd.f32 %v727_v1, %v564_v63  ;;  %v824_v15 = vmul.f32 %v821_v21, %v792_v56  ;;  %v594_v11 = vpop.permute.xlu1 %593 }
 0x1e4   :  { %v817_v9 = vadd.f32 %v813_v59, %v458_v43  ;;  %v795_v12 = vand.u32 2147483647, %v733_v61  ;;  %v845_v35 = vrot.slane %v1614_v5, %v844_v22 }
 0x1e5   :  { %v816_v14 = vadd.f32 %v812_v54, %v453_v37  ;;  %v794_v16 = vand.u32 2147483647, %v728_v60  ;;  %v1128_v17 = vpop.f32.mrb[6].mxu1 }
 0x1e6   :  { %v829_v18 = vadd.f32 %v825_v10, %v817_v9  ;;  %v835_v19 = vmul.f32 %v833_v0, %v795_v12  ;;  %v743_v20 = vadd.f32 %v1128_v17, %v579_v13  ;;  %v737_v62 = vpop.f32.mrb[7].mxu1  ;;  %v609_v10 = vpop.permute.xlu0 %608 }
 0x1e7   :  { %v828_v25 = vadd.f32 %v824_v15, %v816_v14  ;;  %v834_v28 = vmul.f32 %v833_v0, %v794_v16  ;;  %v738_v38 = vadd.f32 %v737_v62, %v1616_v6  ;;  %v604_v48 = vpop.permute.xlu1 %603 }
 0x1e8   :  { %v839_v2 = vadd.f32 %v835_v19, %v827_v58  ;;  %v797_v63 = vand.u32 2147483647, %v743_v20  ;;  %v428_v19 = vadd.f32 %v1531_v23, %v1601_v50  ;;  %v423_v20 = vadd.f32 %v1533_v24, %v1603_v51 }
 0x1e9   :  { %v838_v29 = vadd.f32 %v834_v28, %v826_v8  ;;  %v796_v30 = vand.u32 2147483647, %v738_v38  ;;  %v1131_v31 = vpop.f32.mrb[8].mxu1 }
 0x1ea   :  { %v837_v34 = vmul.f32 %v833_v0, %v797_v63  ;;  %v753_v21 = vadd.f32 %v1131_v31, %v589_v42  ;;  %v747_v36 = vpop.f32.mrb[9].mxu1  ;;  %v478_v28 = vmax.f32 %v428_v19, 0.0 }
 0x1eb   :  { %v836_v39 = vmul.f32 %v833_v0, %v796_v30  ;;  %v748_v40 = vadd.f32 %v747_v36, %v1609_v4  ;;  %v614_v8 = vpop.permute.xlu1 %613 }
 0x1ec   :  { %v841_v41 = vadd.f32 %v837_v34, %v829_v18  ;;  %v799_v43 = vand.u32 2147483647, %v753_v21  ;;  %v181_v18 = vpop.permute.xlu0 %180 }
 0x1ed   :  { %v840_v45 = vadd.f32 %v836_v39, %v828_v25  ;;  %v798_v46 = vand.u32 2147483647, %v748_v40  ;;  %v1134_v6 = vpop.f32.mrb[10].mxu1  ;;  %v438_v38 = vadd.f32 %v1535_v26, %v181_v18 }
 0x1ee   :  { %v847_v32 = vmul.f32 %v845_v35, %v799_v43  ;;  %v763_v47 = vadd.f32 %v1134_v6, %v599_v44  ;;  %v757_v33 = vpop.f32.mrb[11].mxu1 }
 0x1ef   :  { %v846_v49 = vmul.f32 %v845_v35, %v798_v46  ;;  %v758_v52 = vadd.f32 %v757_v33, %v594_v11  ;;  %v619_v17 = vpop.permute.xlu1 %618  ;;  %v477_v11 = vmax.f32 %v423_v20, 0.0  ;;  %v480_v39 = vmax.f32 %v438_v38, 0.0 }
 0x1f0   :  { %v851_v55 = vadd.f32 %v847_v32, %v839_v2  ;;  %v801_v42 = vand.u32 2147483647, %v763_v47  ;;  %v889_v31 = vpop.permute.xlu0 %888 }
 0x1f1   :  { %v850_v56 = vadd.f32 %v846_v49, %v838_v29  ;;  %v800_v5 = vand.u32 2147483647, %v758_v52  ;;  %v1137_v57 = vpop.f32.mrb[12].mxu1  ;;  %v433_v29 = vadd.f32 %v1537_v27, %v1605_v53  ;;  %v906_v43 = vmul.f32 %v889_v31, %v477_v11 }
 0x1f2   :  { %v859_v58 = vmin.f32 %v851_v55, 0.0  ;;  %v849_v59 = vmul.f32 %v845_v35, %v801_v42  ;;  %v767_v4 = vpop.f32.mrb[13].mxu1  ;;  %v773_v62 = vadd.f32 %v1137_v57, %v609_v10  ;;  %vm855_vm1 = vcmp.gt.f32.partialorder %v851_v55, 0.0 }
 0x1f3   :  { %v858_v61 = vmin.f32 %v850_v56, 0.0  ;;  %v848_v0 = vmul.f32 %v845_v35, %v800_v5  ;;  %v768_v22 = vadd.f32 %v767_v4, %v604_v48  ;;  %v894_v63 = vpop.permute.xlu1 %893  ;;  %vm854_vm2 = vcmp.gt.f32.partialorder %v850_v56, 0.0 }
 0x1f4   :  { %v864_v1 = vmul.f32 1.442695, %v859_v58  ;;  %v853_v37 = vadd.f32 %v849_v59, %v841_v41  ;;  %v803_v34 = vand.u32 2147483647, %v773_v62  ;;  %v907_v36 = vmul.f32 %v894_v63, %v478_v28  ;;  %v899_v49 = vpop.permute.xlu0 %898 }
 0x1f5   :  { %v862_v54 = vmul.f32 1.442695, %v858_v61  ;;  %v852_v60 = vadd.f32 %v848_v0, %v840_v45  ;;  %v1140_v9 = vpop.f32.mrb[14].mxu1  ;;  %v802_v24 = vand.u32 2147483647, %v768_v22  ;;  %v479_v44 = vmax.f32 %v433_v29, 0.0 }
 0x1f6   :  { %1197 = vpow2.f32 %v864_v1  ;;  %v861_v12 = vmin.f32 %v853_v37, 0.0  ;;  %v777_v13 = vpop.f32.mrb[15].mxu1  ;;  %v783_v50 = vadd.f32 %v1140_v9, %v619_v17  ;;  %vm857_vm3 = vcmp.gt.f32.partialorder %v853_v37, 0.0 }
 0x1f7   :  { %1199 = vpow2.f32 %v862_v54  ;;  %v860_v14 = vmin.f32 %v852_v60, 0.0  ;;  %v778_v51 = vadd.f32 %v777_v13, %v614_v8  ;;  %v904_v32 = vpop.permute.xlu1 %903  ;;  %vm856_vm4 = vcmp.gt.f32.partialorder %v852_v60, 0.0 }
 0x1f8   :  { %v868_v15 = vmul.f32 1.442695, %v861_v12  ;;  %v805_v46 = vand.u32 2147483647, %v783_v50  ;;  %v909_v52 = vmul.f32 %v904_v32, %v480_v39  ;;  %v908_v5 = vmul.f32 %v899_v49, %v479_v44  ;;  %v927_v9 = vpop.permute.xlu0 %926 }
 0x1f9   :  { %v866_v16 = vmul.f32 1.442695, %v860_v14  ;;  %v804_v48 = vand.u32 2147483647, %v778_v51 }
 0x1fa   :  { %1201 = vpow2.f32 %v868_v15 }
 0x1fb   :  { %1203 = vpow2.f32 %v866_v16 }
 0x200   :  { %v1198_v25 = vpop.eup %1197 }
 0x201   :  { %v1200_v2 = vpop.eup %1199  ;;  %v974_v30 = vadd.f32 -1.0, %v1198_v25 }
 0x202   :  { %v973_v23 = vadd.f32 -1.0, %v1200_v2 }
 0x203   :  { %v875_v21 = vsel %vm855_vm1, %v851_v55, %v974_v30 }
 0x204   :  { %v1202_v35 = vpop.eup %1201  ;;  %v879_v26 = vmul.f32 %v875_v21, %v803_v34  ;;  %v874_v40 = vsel %vm854_vm2, %v850_v56, %v973_v23 }
 0x205   :  { %v1204_v41 = vpop.eup %1203  ;;  %v878_v45 = vmul.f32 %v874_v40, %v802_v24  ;;  %v976_v27 = vadd.f32 -1.0, %v1202_v35 }
 0x206   :  { %v911_v53 = vadd.f32 %v907_v36, %v879_v26  ;;  %v975_v6 = vadd.f32 -1.0, %v1204_v41 }
 0x207   :  { %v910_v47 = vadd.f32 %v906_v43, %v878_v45  ;;  %v877_v33 = vsel %vm857_vm3, %v853_v37, %v976_v27  ;;  %v932_v37 = vrot.slane %v927_v9, %v808_v7 }
 0x208   :  { %v881_v55 = vmul.f32 %v877_v33, %v805_v46  ;;  %v876_v42 = vsel %vm856_vm4, %v852_v60, %v975_v6 }
 0x209   :  { %v914_v56 = vadd.f32 %v911_v53, %v910_v47  ;;  %v880_v57 = vmul.f32 %v876_v42, %v804_v48 }
 0x20a   :  { %v913_v58 = vadd.f32 %v909_v52, %v881_v55 }
 0x20b   :  { %v912_v59 = vadd.f32 %v908_v5, %v880_v57 }
 0x20d   :  { %v915_v4 = vadd.f32 %v914_v56, %v912_v59 }
 0x20f   :  { %v916_v61 = vadd.f32 %v915_v4, %v913_v58 }
 0x211   :  { %v917_v0 = vrot.slane %v916_v61, 4 }
 0x213   :  { %v918_v1 = vadd.f32 %v917_v0, %v916_v61 }
 0x215   :  { %v919_v8 = vrot.slane %v918_v1, 2 }
 0x217   :  { %v920_v54 = vadd.f32 %v919_v8, %v918_v1 }
 0x219   :  { %v921_v10 = vrot.slane %v920_v54, 1 }
 0x21b   :  { %v922_v12 = vadd.f32 %v921_v10, %v920_v54 }
 0x21d   :  { %v933_v60 = vadd.f32 %v932_v37, %v922_v12 }
 0x21f   :  { %934 = vst [vmem:[#allocation3] sm:$0x1] %v933_v60 }
 0x220   :  { %1216 = shalt.err (!%p1213_p4)
}
 0x221   :  { %s1217_s21 = scalar_lea.hbm %s1663_s8, 16 }
 0x222   :  { %p1218_p5 = scmp.ne.s32.totalorder %s1663_s8, %s1217_s21  ;;  %p1221_p6 = scmp.lt.u32.totalorder %s1217_s21, %s1663_s8 }
 0x224   :  { %p1223_p7 = pnand %p1221_p6, %p1218_p5 }
 0x226   :  { %1226 = shalt.err (!%p1223_p7)
}
 0x227   :  { %944 = dma.vmem_to_hbm [thread:$0]  %s942_s18, 16, %s1663_s8, [#allocation4]  }
 0x228   :  { %1227 = dma.done.wait [#allocation4], 16  }
 0x229   :  { %1228 = vsyncadd [#allocation4], 4294967280 }
 0x22a   :  { %948 = vsyncpa [#allocation4], 1 }

</bundles_post_ra>
